<compile_context>
chip_gen: v7x
topology: tpu7x:2x2x1
jax: 0.10.0
libtpu: 0.0.40
codegen_flags: <defaults>
</compile_context>

<pallas_src>
import math
import functools

import jax
import jax.numpy as jnp
from jax.experimental import pallas as pl
from jax.experimental.pallas import tpu as pltpu


# ---------------------------------------------------------------------------
# "__init__" glue: build the (max_len, 1, dim_model) positional-encoding buffer
# exactly like the PyTorch module does.  Build it in the model dtype (bf16 for a
# bf16 model) so the kernel's HBM traffic stays narrow.
# ---------------------------------------------------------------------------
def make_pos_encoding_buffer(dim_model: int, max_len: int, dtype=jnp.float32) -> jnp.ndarray:
    positions = jnp.arange(max_len, dtype=jnp.float32)[:, None]               # (max_len, 1)
    division_term = jnp.exp(
        jnp.arange(0, dim_model, 2, dtype=jnp.float32) * (-math.log(10000.0) / dim_model)
    )                                                                         # (dim_model//2,)
    angles = positions * division_term                                        # (max_len, dim/2)
    pe = jnp.zeros((max_len, dim_model), dtype=jnp.float32)
    pe = pe.at[:, 0::2].set(jnp.sin(angles))
    pe = pe.at[:, 1::2].set(jnp.cos(angles))
    # unsqueeze(0).transpose(0,1)  ->  (max_len, 1, dim_model)
    return pe[:, None, :].astype(dtype)


# ---------------------------------------------------------------------------
# Kernels
# ---------------------------------------------------------------------------
def _add_pe_kernel(x_ref, pe_ref, o_ref):
    # x_ref: (TS, TB, D), pe_ref: (TS, 1, D) -- broadcast over batch on the VPU.
    o_ref[...] = (x_ref[...] + pe_ref[...]).astype(o_ref.dtype)


def _add_pe_dropout_kernel(x_ref, pe_ref, bits_ref, o_ref, *, threshold, inv_keep):
    y = x_ref[...] + pe_ref[...]
    # Inverted dropout (PyTorch semantics): keep w.p. (1-p), scale by 1/(1-p).
    # Integer threshold test -- no shift / int->float convert / float compare.
    keep = bits_ref[...] >= jnp.uint32(threshold)
    y = jnp.where(keep, y * jnp.asarray(inv_keep, y.dtype), jnp.zeros((), y.dtype))
    o_ref[...] = y.astype(o_ref.dtype)


# ---------------------------------------------------------------------------
# Tiling: tile over seq (and batch if it is 8-aligned); keep D whole so the
# output stays lane-dense for real model dims (D a multiple of 128).
# ---------------------------------------------------------------------------
def _pick_tiles(S, B, D, itemsize, target_bytes=2 << 20):
    # Batch tile: second-to-last block dim must be a multiple of 8 or the full axis.
    if B > 8 and B % 8 == 0:
        TB = 8
    else:
        TB = B
    row_bytes = max(TB * D * itemsize, 1)
    TS = max(1, min(S, target_bytes // row_bytes))   # ~2 MiB blocks -> good pipelining
    return int(TS), int(TB)


# ---------------------------------------------------------------------------
# Forward wrapper
# ---------------------------------------------------------------------------
def positional_encoding_forward(
    token_embedding: jnp.ndarray,      # (seq_len, batch, dim_model)
    pos_encoding: jnp.ndarray,         # (max_len, 1, dim_model)
    *,
    dropout_p: float,
    training: bool,
    rng_key=None,
) -> jnp.ndarray:
    S, B, D = token_embedding.shape
    max_len = pos_encoding.shape[0]
    assert S <= max_len, "sequence longer than positional-encoding buffer"

    if pos_encoding.dtype != token_embedding.dtype:
        pos_encoding = pos_encoding.astype(token_embedding.dtype)

    itemsize = jnp.dtype(token_embedding.dtype).itemsize
    TS, TB = _pick_tiles(S, B, D, itemsize)
    grid = (pl.cdiv(S, TS), pl.cdiv(B, TB))          # batch is the inner grid axis

    # No host-side pe[:S] slice: the index_map selects the seq window for free
    # via DMA addressing into the full (max_len, 1, D) buffer.
    x_spec    = pl.BlockSpec((TS, TB, D), lambda si, bi: (si, bi, 0))
    pe_spec   = pl.BlockSpec((TS, 1,  D), lambda si, bi: (si, 0, 0))
    bits_spec = pl.BlockSpec((TS, TB, D), lambda si, bi: (si, bi, 0))
    out_spec  = pl.BlockSpec((TS, TB, D), lambda si, bi: (si, bi, 0))

    use_dropout = bool(training) and dropout_p > 0.0

    # VMEM budget: double-buffered x/out(/bits) blocks + PE blocks + headroom,
    # kept well under v7x's 64 MiB per-TC VMEM.
    block_bytes = TS * TB * D * itemsize
    n_streams = 3 if use_dropout else 2
    vmem_limit = 2 * n_streams * block_bytes + 2 * TS * D * itemsize + (8 << 20)
    vmem_limit = int(min(max(vmem_limit, 16 << 20), 48 << 20))

    compiler_params = pltpu.CompilerParams(
        dimension_semantics=("parallel", "parallel"),
        vmem_limit_bytes=vmem_limit,
    )

    if not use_dropout:
        return pl.pallas_call(
            _add_pe_kernel,
            out_shape=jax.ShapeDtypeStruct((S, B, D), token_embedding.dtype),
            grid_spec=pltpu.PrefetchScalarGridSpec(
                num_scalar_prefetch=0,
                grid=grid,
                in_specs=[x_spec, pe_spec],
                out_specs=out_spec,
            ),
            compiler_params=compiler_params,
        )(token_embedding, pos_encoding)

    if rng_key is None:
        rng_key = jax.random.PRNGKey(0)
    bits = jax.random.bits(rng_key, (S, B, D), dtype=jnp.uint32)
    threshold = min(int(round(dropout_p * (1 << 32))), (1 << 32) - 1)
    inv_keep = 1.0 / (1.0 - dropout_p)
    kernel = functools.partial(_add_pe_dropout_kernel,
                               threshold=threshold, inv_keep=inv_keep)

    return pl.pallas_call(
        kernel,
        out_shape=jax.ShapeDtypeStruct((S, B, D), token_embedding.dtype),
        grid_spec=pltpu.PrefetchScalarGridSpec(
            num_scalar_prefetch=0,
            grid=grid,
            in_specs=[x_spec, pe_spec, bits_spec],
            out_specs=out_spec,
        ),
        compiler_params=compiler_params,
    )(token_embedding, pos_encoding, bits)


# ---------------------------------------------------------------------------
# Demo / correctness check at small module-consistent shapes.
# ---------------------------------------------------------------------------
if __name__ == "__main__":
    dim_model, dropout_p, max_len = 32, 0.1, 16
    seq_len, batch = 8, 2

    pe_buf = make_pos_encoding_buffer(dim_model, max_len)

    key = jax.random.PRNGKey(0)
    k_x, k_drop = jax.random.split(key)
    x = jax.random.normal(k_x, (seq_len, batch, dim_model), dtype=jnp.float32)

    # Eval-mode forward (dropout is identity) -> deterministic, check against reference.
    y_eval = positional_encoding_forward(x, pe_buf, dropout_p=dropout_p, training=False)
    y_eval = jax.block_until_ready(y_eval)
    ref = x + pe_buf[:seq_len]
    assert y_eval.shape == (seq_len, batch, dim_model)
    assert jnp.allclose(y_eval, ref, atol=1e-6), "eval-mode mismatch"

    # Training-mode forward exercises the in-kernel dropout path; the mask is
    # reproducible host-side from the same key, so we can check it exactly.
    y_train = positional_encoding_forward(
        x, pe_buf, dropout_p=dropout_p, training=True, rng_key=k_drop
    )
    y_train = jax.block_until_ready(y_train)
    assert y_train.shape == (seq_len, batch, dim_model)

    bits = jax.random.bits(k_drop, (seq_len, batch, dim_model), dtype=jnp.uint32)
    threshold = jnp.uint32(min(int(round(dropout_p * (1 << 32))), (1 << 32) - 1))
    keep = bits >= threshold
    expected = jnp.where(keep, ref / (1.0 - dropout_p), 0.0)
    assert jnp.allclose(y_train, expected, atol=1e-5), "train-mode mismatch"

    print("KERNEL_OK")
</pallas_src>

<mosaic_0001>
module attributes {stable_mosaic.version = 11 : i64} {
  func.func @_add_pe_kernel(%arg0: i32, %arg1: i32, %arg2: memref<8x2x32xf32, #tpu.memory_space<vmem>>, %arg3: memref<8x1x32xf32, #tpu.memory_space<vmem>>, %arg4: memref<8x2x32xf32, #tpu.memory_space<vmem>>) attributes {dimension_semantics = [#tpu.dimension_semantics<parallel>, #tpu.dimension_semantics<parallel>], iteration_bounds = array<i64: 1, 1>, scalar_prefetch = 0 : i64, scratch_operands = 0 : i64, tpu.core_type = #tpu.core_type<tc>, window_params = [{transform_indices = @transform_0, window_bounds = array<i64: 8, 2, 32>}, {transform_indices = @transform_1, window_bounds = array<i64: 8, 1, 32>}, {transform_indices = @transform_2, window_bounds = array<i64: 8, 2, 32>}]} {
    %c0 = arith.constant 0 : index
    %c0_0 = arith.constant 0 : index
    %c0_1 = arith.constant 0 : index
    %0 = vector.load %arg2[%c0, %c0_0, %c0_1] : memref<8x2x32xf32, #tpu.memory_space<vmem>>, vector<8x2x32xf32>
    %c0_2 = arith.constant 0 : index
    %c0_3 = arith.constant 0 : index
    %c0_4 = arith.constant 0 : index
    %1 = vector.load %arg3[%c0_2, %c0_3, %c0_4] : memref<8x1x32xf32, #tpu.memory_space<vmem>>, vector<8x1x32xf32>
    %2 = vector.broadcast %1 : vector<8x1x32xf32> to vector<8x2x32xf32>
    %3 = arith.addf %0, %2 : vector<8x2x32xf32>
    %c0_5 = arith.constant 0 : index
    %c0_6 = arith.constant 0 : index
    %c0_7 = arith.constant 0 : index
    %4 = vector.load %arg4[%c0_5, %c0_6, %c0_7] : memref<8x2x32xf32, #tpu.memory_space<vmem>>, vector<8x2x32xf32>
    tpu.vector_store %arg4[%c0_5, %c0_6, %c0_7], %3 {strides = array<i32>} : memref<8x2x32xf32, #tpu.memory_space<vmem>>, vector<8x2x32xf32>,
    return
  }
  func.func @transform_0(%arg0: i32, %arg1: i32) -> (i32, i32, i32) {
    %c0_i32 = arith.constant 0 : i32
    %c0_i32_0 = arith.constant 0 : i32
    return %arg0, %arg1, %c0_i32 : i32, i32, i32
  }
  func.func @transform_1(%arg0: i32, %arg1: i32) -> (i32, i32, i32) {
    %c0_i32 = arith.constant 0 : i32
    %c0_i32_0 = arith.constant 0 : i32
    %c0_i32_1 = arith.constant 0 : i32
    return %arg0, %c0_i32, %c0_i32_0 : i32, i32, i32
  }
  func.func @transform_2(%arg0: i32, %arg1: i32) -> (i32, i32, i32) {
    %c0_i32 = arith.constant 0 : i32
    %c0_i32_0 = arith.constant 0 : i32
    return %arg0, %arg1, %c0_i32 : i32, i32, i32
  }
}

</mosaic_0001>

<bundles_post_ra>
// kernel: tpu_custom_call.1
= control target key start
LH: loop header
LB: loop body
LE: loop exit
PB: predicated region body
PF: predicated region fallthrough
CT: control target
= control target key end

     0   :  { %7 = vsyncpa [#allocation3], 0  ;;  %s304_s0 = inlined_call_operand.hbm [shape: f32[8,2,32], index: 0, kind: input, shape index: {}]   ;;  %s305_s1 = inlined_call_operand.hbm [shape: f32[16,1,32], index: 1, kind: input, shape index: {}]   ;;  %s306_s2 = inlined_call_operand.hbm [shape: f32[8,2,32], index: 2, kind: output, shape index: {}]  }
   0x1   :  { %8 = vsyncpa [#allocation6], 0 }
   0x2   :  { %9 = vsyncpa [#allocation4], 0  ;;  %s226_s9 = smov [#allocation2]   ;;  %s154_s13 = scalar_lea.hbm %s304_s0, 256 }
   0x3   :  { %s15_s10 = sshll.u32 %s226_s9, 4  ;;  %p155_p0 = scmp.ne.s32.totalorder %s304_s0, %s154_s13  ;;  %s16_s10 = int_to_ptr.vmem [resolvable:$true] %s15_s10 }
   0x4   :  { %p158_p1 = scmp.lt.u32.totalorder %s154_s13, %s304_s0 }
   0x6   :  { %p160_p2 = pnand %p158_p1, %p155_p0 }
   0x8   :  { %163 = shalt.err (!%p160_p2)
}
   0x9   :  { %s164_s18 = scalar_lea.vmem %s16_s10, 256  ;;  %p169_p4 = scmp.lt.s32.totalorder %s16_s10, %s16_s10 }
   0xa   :  { %p165_p3 = scmp.ne.s32.totalorder %s16_s10, %s164_s18  ;;  %p170_p5 = scmp.lt.s32.totalorder %s164_s18, %s164_s18 }
   0xc   :  { %p171_p6 = por %p170_p5, %p169_p4 }
   0xe   :  { %p172_p7 = pnand %p171_p6, %p165_p3 }
  0x10   :  { %175 = shalt.err (!%p172_p7)
}
  0x11   :  { %s227_s19 = smov 32   ;;  %s228_s20 = smov 2  }
  0x12   :  { %21 = dma.hbm_to_vmem [thread:$0]  %s304_s0, 256, %s16_s10, [#allocation3], %s227_s19, %s227_s19, %s228_s20  }
  0x13   :  { %s229_s23 = smov [#allocation5]   ;;  %s176_s27 = scalar_lea.hbm %s305_s1, 128 }
  0x14   :  { %s27_s24 = sshll.u32 %s229_s23, 4  ;;  %p177_p8 = scmp.ne.s32.totalorder %s305_s1, %s176_s27  ;;  %s28_s24 = int_to_ptr.vmem [resolvable:$true] %s27_s24 }
  0x15   :  { %s178_s4 = scalar_lea.hbm %s305_s1, 256  ;;  %p180_p10 = scmp.lt.u32.totalorder %s176_s27, %s305_s1 }
  0x16   :  { %p179_p9 = scmp.lt.u32.totalorder %s178_s4, %s176_s27 }
  0x18   :  { %p181_p11 = por %p180_p10, %p179_p9 }
  0x1a   :  { %p182_p12 = pnand %p181_p11, %p177_p8 }
  0x1c   :  { %185 = shalt.err (!%p182_p12)
}
  0x1d   :  { %s186_s0 = scalar_lea.vmem %s28_s24, 128  ;;  %p191_p0 = scmp.lt.s32.totalorder %s28_s24, %s28_s24 }
  0x1e   :  { %p187_p13 = scmp.ne.s32.totalorder %s28_s24, %s186_s0  ;;  %p192_p1 = scmp.lt.s32.totalorder %s186_s0, %s186_s0 }
  0x20   :  { %p193_p2 = por %p192_p1, %p191_p0 }
  0x22   :  { %p194_p3 = pnand %p193_p2, %p187_p13 }
  0x24   :  { %197 = shalt.err (!%p194_p3)
}
  0x25   :  { %s230_s7 = smov 16   ;;  %s231_s8 = smov 1  }
  0x26   :  { %33 = dma.hbm_to_vmem [thread:$0]  %s305_s1, 128, %s28_s24, [#allocation6], %s230_s7, %s230_s7, %s231_s8  }
  0x27   :  { %220 = dma.done.wait [#allocation3], 256  }
  0x28   :  { %221 = vsyncadd [#allocation3], 4294967040 }
  0x29   :  { %222 = dma.done.wait [#allocation6], 128  }
  0x2a   :  { %223 = vsyncadd [#allocation6], 4294967168  ;;  %vm112_vm0 = vcmask 254976   ;;  %s232_s11 = smov [#allocation7]   ;;  %v40_v0 = vld [vmem:[#allocation2] sm:$0x3] }
  0x2b   :  { %s278_s12 = sshll.u32 %s232_s11, 4  ;;  %v139_v1 = vld [vmem:[#allocation5] ss:$0 sm:$0xff]  ;;  %v41_v2 = vld [vmem:[#allocation2 + $0x2] sm:$0x3]  ;;  %s127_s12 = int_to_ptr.vmem [resolvable:$true] %s278_s12 }
  0x2c   :  { %v104_v3 = vadd.f32 %v139_v1, %v40_v0  ;;  %v140_v4 = vld [vmem:[#allocation5 + $0x1] ss:$0 sm:$0xff]  ;;  %v42_v5 = vld [vmem:[#allocation2 + $0x4] sm:$0x3]  ;;  %v141_v6 = vld [vmem:[#allocation5 + $0x2] ss:$0 sm:$0xff]  ;;  %p203_p5 = scmp.lt.s32.totalorder %s127_s12, %s127_s12 }
  0x2d   :  { %v105_v7 = vadd.f32 %v140_v4, %v41_v2  ;;  %v106_v8 = vadd.f32 %v141_v6, %v42_v5  ;;  %v43_v9 = vld [vmem:[#allocation2 + $0x6] sm:$0x3]  ;;  %v142_v10 = vld [vmem:[#allocation5 + $0x3] ss:$0 sm:$0xff]  ;;  %v44_v11 = vld [vmem:[#allocation2 + $0x8] sm:$0x3] }
  0x2e   :  { %113 = vst.msk [vmem:[#allocation7] sm:$0x3] %vm112_vm0, %v104_v3  ;;  %v107_v12 = vadd.f32 %v142_v10, %v43_v9  ;;  %v143_v13 = vld [vmem:[#allocation5 + $0x4] ss:$0 sm:$0xff]  ;;  %v45_v14 = vld [vmem:[#allocation2 + $0xa] sm:$0x3] }
  0x2f   :  { %v144_v15 = vld [vmem:[#allocation5 + $0x5] ss:$0 sm:$0xff]  ;;  %114 = vst.msk [vmem:[#allocation7 + $0x2] sm:$0x3] %vm112_vm0, %v105_v7  ;;  %115 = vst.msk [vmem:[#allocation7 + $0x4] sm:$0x3] %vm112_vm0, %v106_v8  ;;  %v108_v16 = vadd.f32 %v143_v13, %v44_v11 }
  0x30   :  { %v109_v17 = vadd.f32 %v144_v15, %v45_v14  ;;  %v46_v18 = vld [vmem:[#allocation2 + $0xc] sm:$0x3]  ;;  %v145_v19 = vld [vmem:[#allocation5 + $0x6] ss:$0 sm:$0xff]  ;;  %v47_v20 = vld [vmem:[#allocation2 + $0xe] sm:$0x3] }
  0x31   :  { %116 = vst.msk [vmem:[#allocation7 + $0x6] sm:$0x3] %vm112_vm0, %v107_v12  ;;  %v110_v21 = vadd.f32 %v145_v19, %v46_v18  ;;  %v146_v22 = vld [vmem:[#allocation5 + $0x7] ss:$0 sm:$0xff]  ;;  %117 = vst.msk [vmem:[#allocation7 + $0x8] sm:$0x3] %vm112_vm0, %v108_v16 }
  0x32   :  { %118 = vst.msk [vmem:[#allocation7 + $0xa] sm:$0x3] %vm112_vm0, %v109_v17  ;;  %v111_v23 = vadd.f32 %v146_v22, %v47_v20  ;;  %s198_s1 = scalar_lea.vmem %s127_s12, 256 }
  0x33   :  { %119 = vst.msk [vmem:[#allocation7 + $0xc] sm:$0x3] %vm112_vm0, %v110_v21  ;;  %p199_p4 = scmp.ne.s32.totalorder %s127_s12, %s198_s1  ;;  %p204_p6 = scmp.lt.s32.totalorder %s198_s1, %s198_s1 }
  0x34   :  { %120 = vst.msk [vmem:[#allocation7 + $0xe] sm:$0x3] %vm112_vm0, %v111_v23 }
  0x35   :  { %p205_p7 = por %p204_p6, %p203_p5 }
  0x37   :  { %p206_p8 = pnand %p205_p7, %p199_p4 }
  0x39   :  { %209 = shalt.err (!%p206_p8)
}
  0x3a   :  { %s210_s15 = scalar_lea.hbm %s306_s2, 256 }
  0x3b   :  { %p211_p9 = scmp.ne.s32.totalorder %s306_s2, %s210_s15  ;;  %p214_p10 = scmp.lt.u32.totalorder %s210_s15, %s306_s2 }
  0x3d   :  { %p216_p11 = pnand %p214_p10, %p211_p9 }
  0x3f   :  { %219 = shalt.err (!%p216_p11)
}
  0x40   :  { %132 = dma.vmem_to_hbm [thread:$0]  %s127_s12, 256, %s306_s2, [#allocation4], %s227_s19, %s227_s19, %s228_s20  }
  0x41   :  { %224 = dma.done.wait [#allocation4], 256  }
  0x42   :  { %225 = vsyncadd [#allocation4], 4294967040 }
  0x43   :  { %136 = vsyncpa [#allocation3], 1 }
  0x44   :  { %137 = vsyncpa [#allocation6], 1 }
  0x45   :  { %138 = vsyncpa [#allocation4], 1 }

</bundles_post_ra>
